<compile_context>
chip_gen: v7x
topology: tpu7x:2x2x1
jax: 0.10.0
libtpu: 0.0.40
codegen_flags: <defaults>
</compile_context>

<pallas_src>
import functools
import math

import jax
import jax.numpy as jnp
from jax import lax
from jax.experimental import pallas as pl
from jax.experimental.pallas import tpu as pltpu


# ----------------------------------------------------------------------------
# Slope setup (deterministic, matches AlibiPositionalBias._get_slopes)
# ----------------------------------------------------------------------------
def _get_slopes(heads: int):
    def get_slopes_power_of_2(n):
        start = 2 ** (-(2 ** (-(math.log2(n) - 3))))
        ratio = start
        return [start * ratio**i for i in range(n)]

    if math.log2(heads).is_integer():
        return get_slopes_power_of_2(heads)
    closest_power_of_2 = 2 ** math.floor(math.log2(heads))
    return (
        get_slopes_power_of_2(closest_power_of_2)
        + get_slopes_power_of_2(2 * closest_power_of_2)[0::2][: heads - closest_power_of_2]
    )


def _round_down(x: int, m: int) -> int:
    return max(m, (x // m) * m)


# ----------------------------------------------------------------------------
# Kernels
# ----------------------------------------------------------------------------
def _alibi_tiled_kernel(slopes_ref, qk_ref, out_ref, *, i_total, j_total):
    """One (ti, tj) tile of one (batch, head).

    bias[i, j] = -|j - (i + (J - I))| * slope[h], built from ONE difference
    iota plus a folded scalar constant (two fewer vector adds + no vector
    negate vs. the naive form).  Remainder tiles compute garbage bias for
    out-of-bounds rows/lanes; Pallas masks the writeback so that is harmless.
    """
    ti, tj = qk_ref.shape
    i0 = pl.program_id(2) * ti
    j0 = pl.program_id(3) * tj
    const = j0 - i0 - (j_total - i_total)          # scalar, folded once per tile
    d = (lax.broadcasted_iota(jnp.int32, (ti, tj), 1)
         - lax.broadcasted_iota(jnp.int32, (ti, tj), 0)) + const
    neg_slope = -slopes_ref[pl.program_id(1)]      # scalar SMEM read (0 for padded heads)
    # Accumulate in f32, single final cast (keeps the v5e VPU path clean for bf16).
    out_ref[...] = (qk_ref[...].astype(jnp.float32)
                    + jnp.abs(d).astype(jnp.float32) * neg_slope).astype(out_ref.dtype)


def _alibi_flat_kernel(bias_ref, qk_ref, out_ref):
    """Lane-dense path: qk/out blocks are (hb, I*J); bias block is (hb, I*J) f32,
    precomputed in the wrapper so the kernel is a pure streaming add."""
    out_ref[...] = (qk_ref[...].astype(jnp.float32) + bias_ref[...]).astype(out_ref.dtype)


# ----------------------------------------------------------------------------
# Wrapper
# ----------------------------------------------------------------------------
def alibi_positional_bias(
    qk_dots: jax.Array,
    heads: int,
    *,
    ti_max: int | None = None,            # optional caps; rounded to (8/16, 128)
    tj_max: int | None = None,
    flat_budget_bytes: int = 4 * 1024 * 1024,
    xla_tiny_bytes: int = 1 * 1024 * 1024,
    target_block_bytes: int = 4 * 1024 * 1024,
) -> jax.Array:
    """qk_dots: (B, H, I, J). Returns qk_dots + alibi bias (heads >= `heads`
    get zero slope, matching pad_at_dim at the END of the head axis)."""
    B, H, I, J = qk_dots.shape
    dtype = qk_dots.dtype
    itemsize = dtype.itemsize

    slopes = jnp.asarray(_get_slopes(heads), dtype=jnp.float32)      # (heads,)
    slopes_full = jnp.zeros((H,), dtype=jnp.float32).at[: min(heads, H)].set(slopes[:H])

    # ---------- tier 0: tiny tensors -> plain XLA (launch overhead dominates) ----------
    if B * H * I * J * itemsize <= xla_tiny_bytes:
        j_ar = jnp.arange(J, dtype=jnp.int32)[None, :]
        i_ar = jnp.arange(J - I, J, dtype=jnp.int32)[:, None]
        bias = -jnp.abs(j_ar - i_ar).astype(jnp.float32)             # (I, J)
        bias = bias[None, :, :] * slopes_full[:, None, None]         # (H, I, J)
        return (qk_dots.astype(jnp.float32) + bias[None]).astype(dtype)

    # ---------- tier 1: flat, lane-dense path for small per-batch slabs ----------
    # (handles any J, including J % 128 != 0 and I < 8, without per-row masked stores)
    if H * I * J * 4 <= flat_budget_bytes:
        IJ = I * J
        qk_flat = qk_dots.reshape(B, H, IJ)
        # Precompute the full (H, I*J) f32 bias ONCE (the PyTorch module caches
        # this as `self.bias`); it is DMA'd as a block input, so the kernel does
        # no per-step broadcast multiply.
        j_ar = jnp.arange(J, dtype=jnp.int32)[None, :]
        i_ar = jnp.arange(J - I, J, dtype=jnp.int32)[:, None]
        dist = -jnp.abs(j_ar - i_ar).astype(jnp.float32)             # (I, J)
        bias_full = dist.reshape(1, IJ) * slopes_full[:, None]       # (H, IJ) f32

        # Split heads into sublane-aligned blocks so a parallel grid axis has
        # extent >= 2 even when B == 1 (v7x megacore); hb always divides H and
        # is a multiple of 8 (or equals H), satisfying the tiling rule.
        if H % 16 == 0:
            hb = H // 2
        elif H % 8 == 0 and H > 8:
            hb = 8
        else:
            hb = H
        n_hblk = H // hb

        out_flat = pl.pallas_call(
            _alibi_flat_kernel,
            out_shape=jax.ShapeDtypeStruct((B, H, IJ), dtype),
            grid=(B, n_hblk),
            in_specs=[
                pl.BlockSpec((hb, IJ), lambda b, ht: (ht, 0)),        # precomputed bias
                pl.BlockSpec((None, hb, IJ), lambda b, ht: (b, ht, 0)),
            ],
            out_specs=pl.BlockSpec((None, hb, IJ), lambda b, ht: (b, ht, 0)),
            input_output_aliases={1: 0},                              # add in place
            compiler_params=pltpu.CompilerParams(
                dimension_semantics=("parallel", "parallel"),
                vmem_limit_bytes=32 * 1024 * 1024,
            ),
        )(bias_full, qk_flat)
        return out_flat.reshape(B, H, I, J)

    # ---------- tier 2: tiled path for real attention sizes ----------
    sub = max(8, 32 // itemsize)                   # sublane granule: 8 f32 / 16 bf16 / 32 i8

    # Lane tile: multiple of 128 whenever J >= 128, so only the final remainder
    # block pays masked stores; dtype-aware cap targets ~4 MiB blocks.
    tj_cap = _round_down(tj_max, 128) if tj_max is not None else max(128, 8192 // itemsize)
    if J % 128 == 0:
        tj = min(J, tj_cap)
    elif J < 128:
        tj = J   # TODO(synk): tiny-J-but-huge-B*H*I could flatten (I,J) and tile that instead.
    else:
        tj = min(_round_down(J, 128), tj_cap)

    # Sublane tile: fill ~target_block_bytes given tj (bigger blocks hide the
    # ~0.35us per-step overhead at v7x's 3.2 TB/s HBM).
    ti_auto = _round_down(max(sub, target_block_bytes // (tj * itemsize)), sub)
    if ti_max is not None:
        ti_auto = min(ti_auto, _round_down(ti_max, sub))
    ti = I if I <= ti_auto else ti_auto

    block_bytes = ti * tj * itemsize
    vmem_limit = int(max(32 * 1024 * 1024,
                         min(64 * 1024 * 1024, 4 * block_bytes + 8 * 1024 * 1024)))
    grid = (B, H, pl.cdiv(I, ti), pl.cdiv(J, tj))
    kernel = functools.partial(_alibi_tiled_kernel, i_total=I, j_total=J)

    return pl.pallas_call(
        kernel,
        out_shape=jax.ShapeDtypeStruct((B, H, I, J), dtype),
        grid=grid,
        in_specs=[
            pl.BlockSpec(memory_space=pltpu.SMEM),   # slopes: whole array in SMEM
            pl.BlockSpec((None, None, ti, tj), lambda b, h, it, jt: (b, h, it, jt)),
        ],
        out_specs=pl.BlockSpec((None, None, ti, tj), lambda b, h, it, jt: (b, h, it, jt)),
        input_output_aliases={1: 0},                 # qk_dots added in place
        compiler_params=pltpu.CompilerParams(
            dimension_semantics=("parallel", "parallel", "parallel", "parallel"),
            vmem_limit_bytes=vmem_limit,             # default 2-deep buffering; bigger blocks
        ),                                           # beat deeper pipelining for streaming add
    )(slopes_full, qk_dots)


# ----------------------------------------------------------------------------
# Pure-JAX reference (mirrors the PyTorch forward)
# ----------------------------------------------------------------------------
def _reference(qk_dots: jax.Array, heads: int) -> jax.Array:
    B, H, I, J = qk_dots.shape
    i_arange = jnp.arange(J - I, J)
    j_arange = jnp.arange(J)
    bias = -jnp.abs(j_arange[None, None, :] - i_arange[None, :, None]).astype(jnp.float32)
    slopes = jnp.asarray(_get_slopes(heads), dtype=jnp.float32).reshape(-1, 1, 1)
    bias = bias * slopes                                          # (heads, I, J)
    pad = H - bias.shape[0]
    bias = jnp.pad(bias, ((0, max(pad, 0)), (0, 0), (0, 0)))[:H]  # pad_at_dim(dim=0)
    return qk_dots + bias[None, ...].astype(qk_dots.dtype)


if __name__ == "__main__":
    key = jax.random.PRNGKey(0)

    # Case 1: flat lane-dense Pallas path (forced), small J.
    B, heads, I, J = 2, 4, 8, 16
    qk = jax.random.normal(key, (B, heads, I, J), dtype=jnp.float32)
    out = jax.block_until_ready(alibi_positional_bias(qk, heads, xla_tiny_bytes=0))
    assert out.shape == qk.shape and out.dtype == qk.dtype
    assert jnp.allclose(out, _reference(qk, heads), atol=1e-5, rtol=1e-5), "flat path mismatch"

    # Case 2: tiled Pallas path (forced), J multiple of 128, zero-slope padded heads (H > heads).
    qk2 = jax.random.normal(jax.random.PRNGKey(1), (1, 6, 16, 128), dtype=jnp.float32)
    out2 = jax.block_until_ready(
        alibi_positional_bias(qk2, 4, xla_tiny_bytes=0, flat_budget_bytes=0))
    assert jnp.allclose(out2, _reference(qk2, 4), atol=1e-5, rtol=1e-5), "tiled path mismatch"

    # Case 3: tiled path with remainder blocks along both I and J (small tile caps).
    qk3 = jax.random.normal(jax.random.PRNGKey(2), (1, 2, 24, 384), dtype=jnp.float32)
    out3 = jax.block_until_ready(
        alibi_positional_bias(qk3, 2, ti_max=16, tj_max=256,
                              xla_tiny_bytes=0, flat_budget_bytes=0))
    assert jnp.allclose(out3, _reference(qk3, 2), atol=1e-5, rtol=1e-5), "tiled remainder mismatch"

    # Case 4: tiled path, J > 128 but not a multiple of 128 -> tj rounded to 128,
    # only the last J-block pays masked stores.
    qk4 = jax.random.normal(jax.random.PRNGKey(3), (1, 2, 16, 200), dtype=jnp.float32)
    out4 = jax.block_until_ready(
        alibi_positional_bias(qk4, 2, xla_tiny_bytes=0, flat_budget_bytes=0))
    assert jnp.allclose(out4, _reference(qk4, 2), atol=1e-5, rtol=1e-5), "non-128 J mismatch"

    # Case 5: flat path with head-blocked grid (H=16 -> two (8, I*J) blocks).
    qk5 = jax.random.normal(jax.random.PRNGKey(4), (1, 16, 8, 24), dtype=jnp.float32)
    out5 = jax.block_until_ready(alibi_positional_bias(qk5, 16, xla_tiny_bytes=0))
    assert jnp.allclose(out5, _reference(qk5, 16), atol=1e-5, rtol=1e-5), "head-block flat mismatch"

    # Case 6: default dispatch on a tiny tensor -> XLA fallback, still correct.
    out6 = jax.block_until_ready(alibi_positional_bias(qk, heads))
    assert jnp.allclose(out6, _reference(qk, heads), atol=1e-5, rtol=1e-5), "xla fallback mismatch"

    print("KERNEL_OK")
</pallas_src>

<mosaic_0001>
module attributes {stable_mosaic.version = 11 : i64} {
  func.func @_alibi_flat_kernel(%arg0: i32, %arg1: i32, %arg2: memref<4x128xf32, #tpu.memory_space<vmem>>, %arg3: memref<1x4x128xf32, #tpu.memory_space<vmem>>, %arg4: memref<1x4x128xf32, #tpu.memory_space<vmem>>) attributes {dimension_semantics = [#tpu.dimension_semantics<parallel>, #tpu.dimension_semantics<parallel>], iteration_bounds = array<i64: 2, 1>, scalar_prefetch = 0 : i64, scratch_operands = 0 : i64, tpu.core_type = #tpu.core_type<tc>, window_params = [{transform_indices = @transform_0, window_bounds = array<i64: 4, 128>}, {transform_indices = @transform_1, window_bounds = array<i64: 1, 4, 128>}, {transform_indices = @transform_2, window_bounds = array<i64: 1, 4, 128>}]} {
    %c0 = arith.constant 0 : index
    %c0_0 = arith.constant 0 : index
    %c0_1 = arith.constant 0 : index
    %0 = vector.load %arg3[%c0, %c0_0, %c0_1] : memref<1x4x128xf32, #tpu.memory_space<vmem>>, vector<1x4x128xf32>
    %1 = vector.shape_cast %0 : vector<1x4x128xf32> to vector<4x128xf32>
    %c0_2 = arith.constant 0 : index
    %c0_3 = arith.constant 0 : index
    %2 = vector.load %arg2[%c0_2, %c0_3] : memref<4x128xf32, #tpu.memory_space<vmem>>, vector<4x128xf32>
    %3 = arith.addf %1, %2 : vector<4x128xf32>
    %c0_4 = arith.constant 0 : index
    %c0_5 = arith.constant 0 : index
    %c0_6 = arith.constant 0 : index
    %4 = vector.load %arg4[%c0_4, %c0_5, %c0_6] : memref<1x4x128xf32, #tpu.memory_space<vmem>>, vector<1x4x128xf32>
    %5 = vector.shape_cast %4 : vector<1x4x128xf32> to vector<4x128xf32>
    %6 = vector.shape_cast %3 : vector<4x128xf32> to vector<1x4x128xf32>
    tpu.vector_store %arg4[%c0_4, %c0_5, %c0_6], %6 {strides = array<i32>} : memref<1x4x128xf32, #tpu.memory_space<vmem>>, vector<1x4x128xf32>,
    return
  }
  func.func @transform_0(%arg0: i32, %arg1: i32) -> (i32, i32) {
    %c0_i32 = arith.constant 0 : i32
    %c0_i32_0 = arith.constant 0 : i32
    return %arg1, %c0_i32 : i32, i32
  }
  func.func @transform_1(%arg0: i32, %arg1: i32) -> (i32, i32, i32) {
    %c0_i32 = arith.constant 0 : i32
    %c0_i32_0 = arith.constant 0 : i32
    return %arg0, %arg1, %c0_i32 : i32, i32, i32
  }
  func.func @transform_2(%arg0: i32, %arg1: i32) -> (i32, i32, i32) {
    %c0_i32 = arith.constant 0 : i32
    %c0_i32_0 = arith.constant 0 : i32
    return %arg0, %arg1, %c0_i32 : i32, i32, i32
  }
}

</mosaic_0001>

<bundles_post_ra>
// kernel: tpu_custom_call.1
= control target key start
LH: loop header
LB: loop body
LE: loop exit
PB: predicated region body
PF: predicated region fallthrough
CT: control target
= control target key end

     0   :  { %7 = vsyncpa [#allocation3], 0  ;;  %s689_s0 = inlined_call_operand.vmem [shape: f32[4,128], index: 0, kind: input, shape index: {}]   ;;  %s690_s1 = inlined_call_operand.hbm [shape: f32[2,4,128], index: 1, kind: input, shape index: {}, may-alias: {1,2}]   ;;  %s691_s2 = inlined_call_operand.hbm [shape: f32[2,4,128], index: 2, kind: output, shape index: {}, may-alias: {1,2}]  }
   0x1   :  { %9 = vsyncpa [#allocation3 + $0x1], 0 }
   0x2   :  { %10 = vsyncpa [#allocation4], 0 }
   0x3   :  { %12 = vsyncpa [#allocation4 + $0x1], 0  ;;  %s514_s9 = smov 0   ;;  %s516_s10 = smov 0  }
   0x4   :  { %s518_s11 = smov 0   ;;  %s520_s12 = smov 0  }
   0x5   :  { %s522_s13 = smov 0   ;;  %s524_s14 = smov 0  }
   0x6 LB: > { %s307_s15 = sadd.s32 4294967295, %s495_s14   ;;  %s308_s16 = sadd.s32 4294967294, %s495_s14   ;;  %s495_s14 = sphi %s524_s14, %s18_s14   ;;  %s491_s13 = sphi %s522_s13, %s707_s13   ;;  %s487_s12 = sphi %s520_s12, %s706_s12   ;;  %s483_s11 = sphi %s518_s11, %s705_s11   ;;  %s479_s10 = sphi %s516_s10, %s704_s10   ;;  %s475_s9 = sphi %s514_s9, %s703_s9  }
   0x7   : > { %s30_s17 = sadd.s32 1, %s491_s13  ;;  %s65_s18 = sadd.s32 1, %s483_s11 }
   0x8   : > { %p32_p0 = scmp.ge.s32.totalorder %s30_s17, 2  ;;  %p72_p1 = scmp.ne.s32.totalorder %s483_s11, %s479_s10 }
   0x9   : > { %p73_p2 = scmp.eq.s32.totalorder %s495_s14, 0  ;;  %p78_p3 = scmp.ne.s32.totalorder %s479_s10, %s475_s9 }
   0xa   : > { %s709_s17 = smov (%p32_p0, %s30_s17), 0  ;;  %p79_p5 = scmp.eq.s32.totalorder %s307_s15, 0 }
   0xb   : > { %p555_p4 = por %p73_p2, %p72_p1  ;;  %s60_s20 = ssub.s32 %s491_s13, %s709_s17 }
   0xc   : > { %p104_p6 = scmp.eq.s32.totalorder %s307_s15, 1  ;;  %p63_p7 = scmp.eq.s32.totalorder %s60_s20, 0 }
   0xd   : > { %p561_p8 = por %p79_p5, %p78_p3  ;;  %p110_p10 = scmp.eq.s32.totalorder %s308_s16, 1 }
   0xe   : > { %p565_p9 = por %p104_p6, %p72_p1  ;;  %p333_p13 = scmp.lt.s32.totalorder %s495_s14, 2 }
   0xf   : > { %s570_s23 = scalar_select %p63_p7, %s483_s11, %s65_s18  }
  0x10   : > { %s695_s22 = scalar_select %p565_p9, 1, 0 }
  0x11   : > { %p572_p11 = por %p110_p10, %p78_p3  ;;  %s137_s25 = sand.u32 1, %s483_s11  }
  0x12   : > { %s312_s26 = sshll.u32 %s137_s25, 2  ;;  %s313_s27 = sshll.u32 %s491_s13, 6 }
  0x13   : > { %s696_s24 = scalar_select %p572_p11, 1, 0 }
  0x14   : > { %s583_s30 = scalar_lea.hbm %s690_s1, %s313_s27  ;;  %s141_s3 = scalar_lea.vmem [#allocation2], %s312_s26 }
  0x15   : > { %s149_s4 = sshll.u32 %s141_s3, 4  ;;  %p589_p0 = pnand %p333_p13, %p555_p4  ;;  %s585_s4 = int_to_ptr.vmem [resolvable:$true] %s149_s4 }
  0x16   : > { %s138_s6 = scalar_lea.sflag [#allocation3], %s137_s25  ;;  %s383_s7 = scalar_lea.hbm %s583_s30, 64 }
  0x17   : > { %p384_p3 = scmp.ne.s32.totalorder %s583_s30, %s383_s7  ;;  %p385_p5 = pneg %p589_p0 }
  0x18   : > { %s388_s16 = scalar_lea.hbm %s690_s1, 128  ;;  %p389_p4 = scmp.lt.u32.totalorder %s583_s30, %s690_s1 }
  0x19   : > { %p386_p6 = pnand %p385_p5, %p384_p3  ;;  %p390_p10 = scmp.lt.u32.totalorder %s388_s16, %s383_s7 }
  0x1a   : > { %p392_p12 = scmp.lt.u32.totalorder %s383_s7, %s583_s30 }
  0x1b   : > { %p387_p7 = pneg %p386_p6  ;;  %p391_p13 = por %p390_p10, %p389_p4 }
  0x1d   : > { %p393_p1 = por %p392_p12, %p391_p13 }
  0x1f   : > { %p394_p2 = pnand %p393_p1, %p387_p7 }
  0x21   : > { %397 = shalt.err (!%p394_p2)
}
  0x22   : > { %s398_s20 = scalar_lea.vmem %s585_s4, 64  ;;  %s497_s25 = smov [#allocation2]  }
  0x23   : > { %p399_p3 = scmp.ne.s32.totalorder %s585_s4, %s398_s20  ;;  %s403_s26 = sshll.u32 %s497_s25, 4  ;;  %s404_s26 = int_to_ptr.vmem [resolvable:$false] %s403_s26 }
  0x24   : > { %s405_s27 = scalar_lea.vmem %s404_s26, 128  ;;  %p406_p9 = scmp.lt.s32.totalorder %s585_s4, %s404_s26 }
  0x25   : > { %p401_p6 = pnand %p399_p3, %p385_p5  ;;  %p407_p4 = scmp.lt.s32.totalorder %s405_s27, %s398_s20 }
  0x27   : > { %p402_p11 = pneg %p401_p6  ;;  %p408_p10 = por %p407_p4, %p406_p9 }
  0x29   : > { %p409_p12 = pnand %p408_p10, %p402_p11 }
  0x2b   : > { %412 = shalt.err (!%p409_p12)
}
  0x2c   : > { %328 = dma.hbm_to_vmem [thread:$0]  (!%p589_p0), %s583_s30, 64, %s585_s4, %s138_s6  }
  0x2d   : > { %p698_p1 = scmp.lt.s32.totalorder %s495_s14, 3  ;;  %p699_p2 = scmp.ge.s32.totalorder %s495_s14, 1 }
  0x2f   : > { %p155_p5 = pnand %p699_p2, %p698_p1 }
  0x30   : > { %s625_s28 = sand.u32 (!%p155_p5), 1, %s479_s10  }
  0x31   : > { %158 = sbr.rel (%p155_p5) target bundleno = 83 (0x53), region = 28  ;;  %s315_s29 = sshll.u32 (!%p155_p5), %s625_s28, 2 }
  0x32   : > { %s161_s3 = scalar_lea.sflag (!%p155_p5), [#allocation3], %s625_s28  ;;  %s164_s7 = scalar_lea.vmem (!%p155_p5), [#allocation2], %s315_s29 }
  0x38   : > { %466 = dma.done.wait (%p561_p8), %s161_s3, 64  }
  0x39   : > { %468 = vsyncadd (%p561_p8), %s161_s3, 4294967232  ;;  %s188_s30 = scalar_lea.vmem [#allocation5], %s315_s29  ;;  %s318_s5 = sshll.u32 %s487_s12, 6  ;;  %v193_v0 = vld [vmem:[%s164_s7] sm:$0xf] }
  0x3a   : > { %s212_s4 = sshll.u32 %s188_s30, 4  ;;  %v194_v1 = vld [vmem:[%s689_s0] sm:$0xf]  ;;  %s642_s21 = scalar_lea.hbm %s691_s2, %s318_s5  ;;  %s637_s4 = int_to_ptr.vmem [resolvable:$true] %s212_s4 }
  0x3b   : > { %v195_v2 = vadd.f32 %v194_v1, %v193_v0  ;;  %s198_s18 = scalar_lea.sflag [#allocation4], %s625_s28  ;;  %s413_s19 = scalar_lea.vmem %s637_s4, 64 }
  0x3c   : > { %p414_p8 = scmp.ne.s32.totalorder %s637_s4, %s413_s19  ;;  %p700_p9 = scmp.ne.s32.totalorder %s695_s22, 0 }
  0x3d   : > { %196 = vst [vmem:[%s188_s30] sm:$0xf] %v195_v2  ;;  %s498_s12 = smov [#allocation5]  }
  0x3e   : > { %p415_p11 = pnand %p414_p8, %p700_p9  ;;  %s417_s20 = sshll.u32 %s498_s12, 4  ;;  %s418_s20 = int_to_ptr.vmem [resolvable:$false] %s417_s20 }
  0x3f   : > { %s419_s25 = scalar_lea.vmem %s418_s20, 128  ;;  %p420_p7 = scmp.lt.s32.totalorder %s637_s4, %s418_s20 }
  0x40   : > { %p416_p0 = pneg %p415_p11  ;;  %p421_p13 = scmp.lt.s32.totalorder %s419_s25, %s413_s19 }
  0x42   : > { %p422_p3 = por %p421_p13, %p420_p7 }
  0x44   : > { %p423_p6 = pnand %p422_p3, %p416_p0 }
  0x46   : > { %426 = shalt.err (!%p423_p6)
}
  0x47   : > { %s427_s26 = scalar_lea.hbm %s642_s21, 64  ;;  %s431_s29 = scalar_lea.hbm %s691_s2, 128 }
  0x48   : > { %p428_p4 = scmp.ne.s32.totalorder %s642_s21, %s427_s26  ;;  %p432_p1 = scmp.lt.u32.totalorder %s642_s21, %s691_s2 }
  0x49   : > { %p433_p2 = scmp.lt.u32.totalorder %s431_s29, %s427_s26  ;;  %p435_p8 = scmp.lt.u32.totalorder %s427_s26, %s642_s21 }
  0x4a   : > { %p429_p10 = pnand %p428_p4, %p700_p9 }
  0x4b   : > { %p434_p5 = por %p433_p2, %p432_p1 }
  0x4c   : > { %p430_p12 = pneg %p429_p10 }
  0x4d   : > { %p436_p11 = por %p435_p8, %p434_p5 }
  0x4f   : > { %p437_p0 = pnand %p436_p11, %p430_p12 }
  0x51   : > { %440 = shalt.err (!%p437_p0)
}
  0x52   : > { %323 = dma.vmem_to_hbm [thread:$0]  (%p700_p9), %s637_s4, 64, %s642_s21, %s198_s18  }
  0x53 PF: > { %s224_s30 = sand.u32 1, %s475_s9   ;;  %p701_p7 = scmp.ne.s32.totalorder %s696_s24, 0 }
  0x54   : > { %p702_p13 = scmp.ge.s32.totalorder %s495_s14, 2  ;;  %s225_s5 = scalar_lea.sflag [#allocation4], %s224_s30 }
  0x56   : > { %p330_p3 = pnand %p702_p13, %p701_p7 }
  0x58   : > { %470 = dma.done.wait (!%p330_p3), %s225_s5, 64  }
  0x59   : > { %472 = vsyncadd (!%p330_p3), %s225_s5, 4294967232  ;;  %s18_s14 = sadd.s32 1, %s495_s14   ;;  %s703_s9 = smov %s479_s10 }
  0x5a   : > { %p15_p6 = scmp.ge.s32.totalorder %s18_s14, 4   ;;  %s704_s10 = smov %s483_s11 }
  0x5b   : > { %s705_s11 = smov %s570_s23  ;;  %s706_s12 = smov %s491_s13 }
  0x5c   : > { %s707_s13 = smov %s709_s17  ;;  %17 = sbr.rel (!%p15_p6) target bundleno = 6 (0x6), region = 76 }
  0x63   :  { %230 = vsyncpa [#allocation3], 1 }
  0x64   :  { %232 = vsyncpa [#allocation3 + $0x1], 1 }
  0x65   :  { %233 = vsyncpa [#allocation4], 1 }
  0x66   :  { %235 = vsyncpa [#allocation4 + $0x1], 1 }

</bundles_post_ra>
